<compile_context>
chip_gen: v7x
topology: tpu7x:2x2x1
jax: 0.10.0
libtpu: 0.0.40
codegen_flags: <defaults>
</compile_context>

<pallas_src>
import functools
import math

import numpy as np
import jax
import jax.numpy as jnp
from jax.experimental import pallas as pl
from jax.experimental.pallas import tpu as pltpu


def _orthogonal_init(key, rows, cols, gain):
    """Deterministic orthogonal init (matches nn.init.orthogonal_ semantics)."""
    a = jax.random.normal(key, (max(rows, cols), min(rows, cols)), dtype=jnp.float32)
    q, r = jnp.linalg.qr(a)
    s = jnp.sign(jnp.diagonal(r))
    s = jnp.where(s == 0, 1.0, s)        # guard: sign(0) would zero a column
    q = q * s[None, :]
    if rows < cols:
        q = q.T
    return gain * q[:rows, :cols]


def _categorical_packed_kernel(x_ref, w_ref, b_ref, ones_ref, out_ref, *, compute_dtype):
    """One batch tile, P samples packed per 128-lane row.

    x_ref:    (tb2, P*F)  input dtype (cast to compute_dtype here, under the DMA shadow)
    w_ref:    (P*F, P*N)  block-diagonal weight, compute_dtype (VMEM-resident)
    b_ref:    (1,  P*N)   tiled bias, f32
    ones_ref: (P*N, P*N)  0/1 block-diagonal "segmented sum + broadcast" matrix, bf16
    out_ref:  (tb2, P*N)  normalized logits, packed layout
    """
    x = x_ref[...].astype(compute_dtype)

    # Block-diagonal matmul: P samples' logits side by side -> lane-dense (tb2, 128).
    z = jnp.dot(x, w_ref[...], preferred_element_type=jnp.float32) + b_ref[...]

    # Stabilize with the packed-row max (covers P samples; >= each sample's own max, so
    # logsumexp = m + log(sum exp(z - m)) is unchanged.  Only risk is exp underflow if a
    # sample's max sits > ~87 below the packed-row max -- guarded by the clamp below.)
    m = jnp.max(z, axis=-1, keepdims=True)
    e = jnp.exp(z - m)                                   # dense EUP work

    # Segmented (per-sample) sum of e, broadcast back onto that sample's N lanes, via a
    # 0/1 block-diagonal matmul on the MXU.  Splitting e into bf16 hi + lo keeps the sum
    # exact to f32 rounding (0/1 weights make every partial product exact).
    e_hi = e.astype(ones_ref.dtype)
    e_lo = (e - e_hi.astype(jnp.float32)).astype(ones_ref.dtype)
    s = (jnp.dot(e_hi, ones_ref[...], preferred_element_type=jnp.float32)
         + jnp.dot(e_lo, ones_ref[...], preferred_element_type=jnp.float32))
    s = jnp.maximum(s, jnp.finfo(jnp.float32).tiny)      # graceful degenerate-case guard

    lse = m + jnp.log(s)
    out_ref[...] = (z - lse).astype(out_ref.dtype)


def categorical_forward(x, weight, bias, *, block_b=32768,
                        compute_dtype=jnp.bfloat16, out_dtype=jnp.bfloat16):
    """Normalized logits of FixedCategorical(logits=Linear(x)).

    probs = exp(logits) (lazy in torch); mode() = argmax(logits, -1, keepdims=True).
    compute_dtype=jnp.float32 / out_dtype=jnp.float32 give the full-precision path if
    RL log-prob ratios need it; the kernel stays HBM-bound either way.
    """
    B, F = x.shape
    F2, N = weight.shape
    assert F == F2

    # Lane-packing factor: P samples of N logits per 128-lane row.  Falls back to P=1
    # (still correct, just lane-sparse) when N does not divide 128 or B % P != 0.
    P = 128 // N if 0 < N <= 128 else 1
    P = math.gcd(P, B) if P > 1 else 1
    P = max(P, 1)
    B2, PF, PN = B // P, P * F, P * N

    # Free row-major reshape (dim merge) -- no HBM pass, unlike a pad/cast/transpose.
    x2 = x.reshape(B2, PF)
    w_bd = jnp.kron(jnp.eye(P, dtype=jnp.float32),
                    weight.astype(jnp.float32)).astype(compute_dtype)     # (PF, PN), tiny
    b2 = jnp.tile(bias.astype(jnp.float32), (P,)).reshape(1, PN)
    ones_blk = jnp.kron(jnp.eye(P, dtype=jnp.float32),
                        jnp.ones((N, N), dtype=jnp.float32)).astype(jnp.bfloat16)

    # Batch tile in packed rows: multiple of 8 sublanes, or the whole (ragged) dim.
    # block_b counts original samples; default 32k amortizes per-step pipeline overhead
    # while staying within v5e's scoped-VMEM budget (vmem_limit_bytes raised below;
    # re-derive for v7x's 64 MiB/TC if tiles are pushed much larger).
    tb2 = max(8, (max(int(block_b), P) // P) // 8 * 8)
    if tb2 >= B2:
        tb2 = B2
    grid = (pl.cdiv(B2, tb2),)

    out_itemsize = jnp.dtype(out_dtype).itemsize
    cost = pl.CostEstimate(
        flops=2 * B2 * PF * PN + 4 * B2 * PN * PN,
        transcendentals=2 * B2 * PN,
        bytes_accessed=(x.dtype.itemsize * B * F + out_itemsize * B * N
                        + 2 * PF * PN + 2 * PN * PN + 4 * PN),
    )

    out = pl.pallas_call(
        functools.partial(_categorical_packed_kernel, compute_dtype=compute_dtype),
        out_shape=jax.ShapeDtypeStruct((B2, PN), out_dtype),
        grid=grid,
        in_specs=[
            pl.BlockSpec((tb2, PF), lambda i: (i, 0)),    # batch-tiled activations
            pl.BlockSpec((PF, PN), lambda i: (0, 0)),     # weight: VMEM-resident
            pl.BlockSpec((1, PN), lambda i: (0, 0)),      # bias: VMEM-resident
            pl.BlockSpec((PN, PN), lambda i: (0, 0)),     # segmented-sum matrix
        ],
        out_specs=pl.BlockSpec((tb2, PN), lambda i: (i, 0)),
        compiler_params=pltpu.CompilerParams(
            dimension_semantics=("parallel",),            # v7x: shard batch over both TCs
            vmem_limit_bytes=64 * 1024 * 1024,
        ),
        cost_estimate=cost,
    )(x2, w_bd, b2, ones_blk)

    # Free row-major reshape back to the natural (B, N) logits.
    return out.reshape(B, N)


if __name__ == "__main__":
    # Small shapes implied by the module: Linear(num_inputs, num_outputs).
    batch, num_inputs, num_outputs = 1000, 32, 16

    key = jax.random.PRNGKey(0)
    kx, kw = jax.random.split(key)
    x = jax.random.normal(kx, (batch, num_inputs), dtype=jnp.float32)

    # nn.Linear weight is (num_outputs, num_inputs); orthogonal_ with gain=0.01, bias 0.
    # Stored transposed as (F, N) so the kernel computes x @ W.
    w_torch_layout = _orthogonal_init(kw, num_outputs, num_inputs, gain=0.01)
    weight = jnp.asarray(w_torch_layout).T  # (F, N)
    bias = jnp.zeros((num_outputs,), dtype=jnp.float32)

    # Reference with the same bf16-input / f32-accumulate contract the kernel uses.
    z_ref = jnp.dot(x.astype(jnp.bfloat16), weight.astype(jnp.bfloat16),
                    preferred_element_type=jnp.float32) + bias[None, :]
    logits_ref = np.asarray(z_ref - jax.scipy.special.logsumexp(z_ref, axis=-1, keepdims=True))

    # (A) Small tiles -> multi-step grid with a ragged, masked last block; f32 writeback
    #     so the packing / segmented-sum / masking machinery gets a tight check.
    logits_a = categorical_forward(x, weight, bias, block_b=256, out_dtype=jnp.float32)
    jax.block_until_ready(logits_a)
    np.testing.assert_allclose(np.asarray(logits_a), logits_ref, atol=1e-4, rtol=0)

    # (B) Production defaults: large tile (single step at this toy size), bf16 writeback.
    logits_b = categorical_forward(x, weight, bias)
    jax.block_until_ready(logits_b)
    np.testing.assert_allclose(np.asarray(logits_b, dtype=np.float32), logits_ref,
                               atol=3e-2, rtol=0)

    # FixedCategorical.mode(): argmax straight on logits (no separate probs HBM pass).
    mode = jnp.argmax(logits_b, axis=-1, keepdims=True)
    # torch's lazy .probs, only if eagerly needed:
    probs = jnp.exp(logits_b.astype(jnp.float32))
    assert np.allclose(np.asarray(probs).sum(-1), 1.0, atol=2e-2)
    assert mode.shape == (batch, 1)

    # TODO(synk): FixedCategorical.sample() / log_probs() are stateful RNG draws and
    # action-indexing glue, left outside the kernel (plain JAX on the returned logits).
    print("KERNEL_OK")
</pallas_src>

<mosaic_0001>
module attributes {stable_mosaic.version = 11 : i64} {
  func.func @_categorical_packed_kernel(%arg0: i32, %arg1: memref<32x256xf32, #tpu.memory_space<vmem>>, %arg2: memref<256x128xbf16, #tpu.memory_space<vmem>>, %arg3: memref<1x128xf32, #tpu.memory_space<vmem>>, %arg4: memref<128x128xbf16, #tpu.memory_space<vmem>>, %arg5: memref<32x128xf32, #tpu.memory_space<vmem>>) attributes {dimension_semantics = [#tpu.dimension_semantics<parallel>], iteration_bounds = array<i64: 4>, scalar_prefetch = 0 : i64, scratch_operands = 0 : i64, tpu.core_type = #tpu.core_type<tc>, window_params = [{transform_indices = @transform_0, window_bounds = array<i64: 32, 256>}, {pipeline_mode = #tpu.pipeline_mode<synchronous>, transform_indices = @transform_1, window_bounds = array<i64: 256, 128>}, {pipeline_mode = #tpu.pipeline_mode<synchronous>, transform_indices = @transform_2, window_bounds = array<i64: 1, 128>}, {pipeline_mode = #tpu.pipeline_mode<synchronous>, transform_indices = @transform_3, window_bounds = array<i64: 128, 128>}, {transform_indices = @transform_4, window_bounds = array<i64: 32, 128>}]} {
    %c0 = arith.constant 0 : index
    %c0_0 = arith.constant 0 : index
    %0 = vector.load %arg1[%c0, %c0_0] : memref<32x256xf32, #tpu.memory_space<vmem>>, vector<32x256xf32>
    %1 = arith.truncf %0 : vector<32x256xf32> to vector<32x256xbf16>
    %c0_1 = arith.constant 0 : index
    %c0_2 = arith.constant 0 : index
    %2 = vector.load %arg2[%c0_1, %c0_2] : memref<256x128xbf16, #tpu.memory_space<vmem>>, vector<256x128xbf16>
    %cst = arith.constant dense<0.000000e+00> : vector<32x128xf32>
    %3 = tpu.matmul %1, %2, %cst {dimension_numbers = #tpu.dot_dimension_numbers<[1], [0], [0], [1], [0, 0, 1, 1], [], []>} : vector<32x256xbf16>, vector<256x128xbf16>, vector<32x128xf32> -> vector<32x128xf32>
    %c0_3 = arith.constant 0 : index
    %c0_4 = arith.constant 0 : index
    %4 = vector.load %arg3[%c0_3, %c0_4] : memref<1x128xf32, #tpu.memory_space<vmem>>, vector<1x128xf32>
    %5 = vector.broadcast %4 : vector<1x128xf32> to vector<32x128xf32>
    %6 = arith.addf %3, %5 : vector<32x128xf32>
    %cst_5 = arith.constant dense<0xFF800000> : vector<32xf32>
    %7 = vector.multi_reduction <maximumf>, %6, %cst_5 [1] : vector<32x128xf32> to vector<32xf32>
    %8 = vector.shape_cast %7 : vector<32xf32> to vector<32x1xf32>
    %9 = vector.broadcast %8 : vector<32x1xf32> to vector<32x128xf32>
    %10 = arith.subf %6, %9 : vector<32x128xf32>
    %11 = math.exp %10 : vector<32x128xf32>
    %12 = arith.truncf %11 : vector<32x128xf32> to vector<32x128xbf16>
    %13 = arith.extf %12 : vector<32x128xbf16> to vector<32x128xf32>
    %14 = arith.subf %11, %13 : vector<32x128xf32>
    %15 = arith.truncf %14 : vector<32x128xf32> to vector<32x128xbf16>
    %c0_6 = arith.constant 0 : index
    %c0_7 = arith.constant 0 : index
    %16 = vector.load %arg4[%c0_6, %c0_7] : memref<128x128xbf16, #tpu.memory_space<vmem>>, vector<128x128xbf16>
    %cst_8 = arith.constant dense<0.000000e+00> : vector<32x128xf32>
    %17 = tpu.matmul %12, %16, %cst_8 {dimension_numbers = #tpu.dot_dimension_numbers<[1], [0], [0], [1], [0, 0, 1, 1], [], []>} : vector<32x128xbf16>, vector<128x128xbf16>, vector<32x128xf32> -> vector<32x128xf32>
    %c0_9 = arith.constant 0 : index
    %c0_10 = arith.constant 0 : index
    %18 = vector.load %arg4[%c0_9, %c0_10] : memref<128x128xbf16, #tpu.memory_space<vmem>>, vector<128x128xbf16>
    %cst_11 = arith.constant dense<0.000000e+00> : vector<32x128xf32>
    %19 = tpu.matmul %15, %18, %cst_11 {dimension_numbers = #tpu.dot_dimension_numbers<[1], [0], [0], [1], [0, 0, 1, 1], [], []>} : vector<32x128xbf16>, vector<128x128xbf16>, vector<32x128xf32> -> vector<32x128xf32>
    %20 = arith.addf %17, %19 : vector<32x128xf32>
    %cst_12 = arith.constant 1.17549435E-38 : f32
    %21 = vector.broadcast %cst_12 : f32 to vector<32x128xf32>
    %22 = arith.maximumf %20, %21 : vector<32x128xf32>
    %23 = math.log %22 : vector<32x128xf32>
    %24 = vector.broadcast %8 : vector<32x1xf32> to vector<32x128xf32>
    %25 = arith.addf %24, %23 : vector<32x128xf32>
    %26 = arith.subf %6, %25 : vector<32x128xf32>
    %c0_13 = arith.constant 0 : index
    %c0_14 = arith.constant 0 : index
    %27 = vector.load %arg5[%c0_13, %c0_14] : memref<32x128xf32, #tpu.memory_space<vmem>>, vector<32x128xf32>
    tpu.vector_store %arg5[%c0_13, %c0_14], %26 {strides = array<i32>} : memref<32x128xf32, #tpu.memory_space<vmem>>, vector<32x128xf32>,
    return
  }
  func.func @transform_0(%arg0: i32) -> (i32, i32) {
    %c0_i32 = arith.constant 0 : i32
    %c0_i32_0 = arith.constant 0 : i32
    return %arg0, %c0_i32 : i32, i32
  }
  func.func @transform_1(%arg0: i32) -> (i32, i32) {
    %c0_i32 = arith.constant 0 : i32
    %c0_i32_0 = arith.constant 0 : i32
    %c0_i32_1 = arith.constant 0 : i32
    return %c0_i32, %c0_i32_0 : i32, i32
  }
  func.func @transform_2(%arg0: i32) -> (i32, i32) {
    %c0_i32 = arith.constant 0 : i32
    %c0_i32_0 = arith.constant 0 : i32
    %c0_i32_1 = arith.constant 0 : i32
    return %c0_i32, %c0_i32_0 : i32, i32
  }
  func.func @transform_3(%arg0: i32) -> (i32, i32) {
    %c0_i32 = arith.constant 0 : i32
    %c0_i32_0 = arith.constant 0 : i32
    %c0_i32_1 = arith.constant 0 : i32
    return %c0_i32, %c0_i32_0 : i32, i32
  }
  func.func @transform_4(%arg0: i32) -> (i32, i32) {
    %c0_i32 = arith.constant 0 : i32
    %c0_i32_0 = arith.constant 0 : i32
    return %arg0, %c0_i32 : i32, i32
  }
}

</mosaic_0001>

<bundles_post_ra>
// kernel: tpu_custom_call.1
= control target key start
LH: loop header
LB: loop body
LE: loop exit
PB: predicated region body
PF: predicated region fallthrough
CT: control target
= control target key end

     0   :  { %9 = vsyncpa [#allocation3], 0  ;;  %s1593_s0 = inlined_call_operand.hbm [shape: f32[125,256], index: 0, kind: input, shape index: {}]   ;;  %s1594_s1 = inlined_call_operand.hbm [shape: bf16[256,128], index: 1, kind: input, shape index: {}]   ;;  %s1595_s2 = inlined_call_operand.hbm [shape: f32[1,128], index: 2, kind: input, shape index: {}]   ;;  %s1596_s3 = inlined_call_operand.hbm [shape: bf16[128,128], index: 3, kind: input, shape index: {}]   ;;  %s1597_s4 = inlined_call_operand.hbm [shape: f32[125,128], index: 4, kind: output, shape index: {}]  }
   0x1   :  { %11 = vsyncpa [#allocation3 + $0x1], 0 }
   0x2   :  { %12 = vsyncpa [#allocation6], 0 }
   0x3   :  { %13 = vsyncpa [#allocation9], 0 }
   0x4   :  { %14 = vsyncpa [#allocation4], 0 }
   0x5   :  { %16 = vsyncpa [#allocation4 + $0x1], 0  ;;  %s1282_s15 = smov 0   ;;  %s1284_s16 = smov 0  }
   0x6   :  { %s1286_s17 = smov 0   ;;  %s1288_s18 = smov 0  }
   0x7 LB: > { %s1303_s19 = sadd.s32 4294967295, %s1244_s18   ;;  %s792_s20 = sadd.s32 4294967294, %s1244_s18   ;;  %s1244_s18 = sphi %s1288_s18, %s1619_s18   ;;  %s1240_s17 = sphi %s1286_s17, %s1618_s17   ;;  %s1236_s16 = sphi %s1284_s16, %s1617_s16   ;;  %s1232_s15 = sphi %s1282_s15, %s1616_s15  }
   0x8   : > { %p42_p0 = scmp.ne.s32.totalorder %s1236_s16, %s1232_s15  ;;  %p1598_p1 = scmp.eq.s32.totalorder %s1303_s19, 0 }
   0x9   : > { %p135_p3 = scmp.eq.s32.totalorder %s792_s20, 3  ;;  %p793_p5 = scmp.ge.s32.totalorder %s1244_s18, 1 }
   0xa   : > { %p1312_p4 = por %p1598_p1, %p42_p0  ;;  %p142_p7 = scmp.lt.s32.totalorder %s1244_s18, 5 }
   0xb   : > { %p1317_p6 = por %p135_p3, %p42_p0  ;;  %s1246_s24 = smov [#allocation5]  }
   0xc   : > { %s1601_s21 = scalar_select %p1312_p4, 1, 0 }
   0xd   : > { %s1602_s22 = scalar_select %p1317_p6, 1, 0 }
   0xe   : > { %p1322_p8 = pnand %p793_p5, %p142_p7  ;;  %s154_s25 = sshll.u32 %s1246_s24, 4  ;;  %s1326_s25 = int_to_ptr.vmem [resolvable:$true] %s154_s25 }
   0xf   : > { %s1247_s27 = smov [#allocation7]   ;;  %s1248_s29 = smov [#allocation8]  }
  0x10   : > { %s1603_s23 = scalar_select %p1322_p8, 1, 0 }
  0x11   : > { %p949_p9 = pneg %p1322_p8  ;;  %s168_s28 = sshll.u32 %s1247_s27, 4  ;;  %s1336_s28 = int_to_ptr.vmem [resolvable:$true] %s168_s28 }
  0x12   : > { %s1338_s30 = sshll.u32 %s1248_s29, 4  ;;  %s1056_s7 = scalar_lea.hbm %s1594_s1, 2048  ;;  %s179_s30 = int_to_ptr.vmem [resolvable:$true] %s1338_s30 }
  0x13   : > { %p1332_p10 = pnand %p949_p9, %p1598_p1  ;;  %p1057_p11 = scmp.ne.s32.totalorder %s1594_s1, %s1056_s7 }
  0x14   : > { %p1063_p3 = scmp.lt.u32.totalorder %s1056_s7, %s1594_s1 }
  0x15   : > { %p1348_p12 = pneg %p1332_p10 }
  0x17   : > { %p1059_p13 = pnand %p1348_p12, %p1057_p11 }
  0x19   : > { %p1060_p0 = pneg %p1059_p13 }
  0x1b   : > { %p1065_p5 = pnand %p1063_p3, %p1060_p0 }
  0x1d   : > { %1068 = shalt.err (!%p1065_p5)
}
  0x1e   : > { %s1069_s13 = scalar_lea.vmem %s1326_s25, 2048  ;;  %p1077_p2 = scmp.lt.s32.totalorder %s1326_s25, %s1326_s25 }
  0x1f   : > { %p1070_p7 = scmp.ne.s32.totalorder %s1326_s25, %s1069_s13  ;;  %p1078_p6 = scmp.lt.s32.totalorder %s1069_s13, %s1069_s13 }
  0x21   : > { %p1072_p9 = pnand %p1070_p7, %p1348_p12  ;;  %p1079_p11 = por %p1078_p6, %p1077_p2 }
  0x23   : > { %p1073_p1 = pneg %p1072_p9 }
  0x25   : > { %p1080_p13 = pnand %p1079_p11, %p1073_p1 }
  0x27   : > { %1083 = shalt.err (!%p1080_p13)
}
  0x28   : > { %s1249_s14 = smov 64   ;;  %s1250_s20 = smov 4  }
  0x29   : > { %952 = dma.hbm_to_vmem [thread:$0]  (!%p1332_p10), %s1594_s1, 2048, %s1326_s25, [#allocation6], %s1249_s14, %s1249_s14, %s1250_s20  }
  0x2a   : > { %s1084_s6 = scalar_lea.hbm %s1595_s2, 16 }
  0x2b   : > { %p1085_p1 = scmp.ne.s32.totalorder %s1595_s2, %s1084_s6  ;;  %p1091_p0 = scmp.lt.u32.totalorder %s1084_s6, %s1595_s2 }
  0x2d   : > { %p1087_p2 = pnand %p1085_p1, %p1348_p12 }
  0x2f   : > { %p1088_p6 = pneg %p1087_p2 }
  0x31   : > { %p1093_p3 = pnand %p1091_p0, %p1088_p6 }
  0x33   : > { %1096 = shalt.err (!%p1093_p3)
}
  0x34   : > { %s1097_s25 = scalar_lea.vmem %s1336_s28, 16  ;;  %s1104_s12 = scalar_lea.vmem %s1336_s28, 32 }
  0x35   : > { %p1098_p5 = scmp.ne.s32.totalorder %s1336_s28, %s1097_s25  ;;  %p1105_p11 = scmp.lt.s32.totalorder %s1336_s28, %s1336_s28 }
  0x36   : > { %p1106_p13 = scmp.lt.s32.totalorder %s1104_s12, %s1097_s25 }
  0x37   : > { %p1100_p7 = pnand %p1098_p5, %p1348_p12 }
  0x38   : > { %p1107_p1 = por %p1106_p13, %p1105_p11 }
  0x39   : > { %p1101_p9 = pneg %p1100_p7 }
  0x3b   : > { %p1108_p2 = pnand %p1107_p1, %p1101_p9 }
  0x3d   : > { %1111 = shalt.err (!%p1108_p2)
}
  0x3e   : > { %955 = dma.hbm_to_vmem [thread:$0]  (!%p1332_p10), %s1595_s2, 16, %s1336_s28, [#allocation6]  }
  0x3f   : > { %s1112_s5 = scalar_lea.hbm %s1596_s3, 1024 }
  0x40   : > { %p1113_p6 = scmp.ne.s32.totalorder %s1596_s3, %s1112_s5  ;;  %p1119_p5 = scmp.lt.u32.totalorder %s1112_s5, %s1596_s3 }
  0x42   : > { %p1115_p0 = pnand %p1113_p6, %p1348_p12 }
  0x44   : > { %p1116_p3 = pneg %p1115_p0 }
  0x46   : > { %p1121_p7 = pnand %p1119_p5, %p1116_p3 }
  0x48   : > { %1124 = shalt.err (!%p1121_p7)
}
  0x49   : > { %s1125_s11 = scalar_lea.vmem %s179_s30, 1024  ;;  %p1133_p1 = scmp.lt.s32.totalorder %s179_s30, %s179_s30 }
  0x4a   : > { %p1126_p9 = scmp.ne.s32.totalorder %s179_s30, %s1125_s11  ;;  %p1134_p2 = scmp.lt.s32.totalorder %s1125_s11, %s1125_s11 }
  0x4c   : > { %p1128_p11 = pnand %p1126_p9, %p1348_p12  ;;  %p1135_p4 = por %p1134_p2, %p1133_p1 }
  0x4e   : > { %p1129_p13 = pneg %p1128_p11 }
  0x50   : > { %p1136_p8 = pnand %p1135_p4, %p1129_p13 }
  0x52   : > { %1139 = shalt.err (!%p1136_p8)
}
  0x53   : > { %958 = dma.hbm_to_vmem [thread:$0]  (!%p1332_p10), %s1596_s3, 1024, %s179_s30, [#allocation9], %s1249_s14, %s1249_s14, %s1250_s20  }
  0x54   : > { %s1419_s10 = sadd.s32 1, %s1244_s18   ;;  %s29_s12 = sadd.s32 1, %s1240_s17 }
  0x55   : > { %s26_s26 = ssub.s32 %s1244_s18, %s1419_s10  ;;  %p36_p8 = scmp.ne.s32.totalorder %s1240_s17, %s1236_s16 }
  0x56   : > { %p27_p4 = scmp.eq.s32.totalorder %s26_s26, 0  ;;  %p37_p12 = scmp.eq.s32.totalorder %s1244_s18, 0 }
  0x57   : > { %p970_p6 = scmp.lt.s32.totalorder %s1244_s18, 4  ;;  %p1606_p3 = scmp.eq.s32.totalorder %s1303_s19, 3 }
  0x58   : > { %s1429_s13 = scalar_select %p27_p4, %s1240_s17, %s29_s12  }
  0x59   : > { %p38_p0 = por %p37_p12, %p36_p8  ;;  %p1433_p5 = por %p1606_p3, %p36_p8 }
  0x5a   : > { %s192_s27 = sand.u32 1, %s1240_s17   ;;  %s839_s29 = sshll.u32 %s1244_s18, 10 }
  0x5b   : > { %s798_s30 = sshll.u32 %s192_s27, 6  ;;  %s1442_s5 = scalar_lea.hbm %s1593_s0, %s839_s29 }
  0x5c   : > { %s196_s6 = scalar_lea.vmem [#allocation2], %s798_s30  ;;  %p1444_p10 = pnand %p970_p6, %p38_p0 }
  0x5d   : > { %s204_s7 = sshll.u32 %s196_s6, 4  ;;  %s1450_s9 = scalar_lea.sflag [#allocation3], %s192_s27  ;;  %s1448_s7 = int_to_ptr.vmem [resolvable:$true] %s204_s7 }
  0x5e   : > { %s1140_s11 = scalar_lea.hbm %s1442_s5, 1024  ;;  %p1142_p9 = pneg %p1444_p10 }
  0x5f   : > { %p1141_p7 = scmp.ne.s32.totalorder %s1442_s5, %s1140_s11  ;;  %s1145_s26 = scalar_lea.hbm %s1593_s0, 4096 }
  0x60   : > { %p1146_p1 = scmp.lt.u32.totalorder %s1442_s5, %s1593_s0  ;;  %p1147_p2 = scmp.lt.u32.totalorder %s1145_s26, %s1140_s11 }
  0x61   : > { %p1143_p11 = pnand %p1142_p9, %p1141_p7  ;;  %p1149_p8 = scmp.lt.u32.totalorder %s1140_s11, %s1442_s5 }
  0x62   : > { %p1148_p4 = por %p1147_p2, %p1146_p1 }
  0x63   : > { %p1144_p13 = pneg %p1143_p11 }
  0x64   : > { %p1150_p12 = por %p1149_p8, %p1148_p4 }
  0x66   : > { %p1151_p6 = pnand %p1150_p12, %p1144_p13 }
  0x68   : > { %1154 = shalt.err (!%p1151_p6)
}
  0x69   : > { %s1155_s27 = scalar_lea.vmem %s1448_s7, 1024  ;;  %s1251_s30 = smov [#allocation2]  }
  0x6a   : > { %p1156_p0 = scmp.ne.s32.totalorder %s1448_s7, %s1155_s27  ;;  %s1160_s14 = sshll.u32 %s1251_s30, 4  ;;  %s1161_s14 = int_to_ptr.vmem [resolvable:$false] %s1160_s14 }
  0x6b   : > { %s1162_s20 = scalar_lea.vmem %s1161_s14, 2048  ;;  %p1163_p11 = scmp.lt.s32.totalorder %s1448_s7, %s1161_s14 }
  0x6c   : > { %p1158_p3 = pnand %p1156_p0, %p1142_p9  ;;  %p1164_p1 = scmp.lt.s32.totalorder %s1162_s20, %s1155_s27 }
  0x6e   : > { %p1159_p7 = pneg %p1158_p3  ;;  %p1165_p2 = por %p1164_p1, %p1163_p11 }
  0x70   : > { %p1166_p4 = pnand %p1165_p2, %p1159_p7 }
  0x72   : > { %1169 = shalt.err (!%p1166_p4)
}
  0x73   : > { %s1252_s6 = smov 256   ;;  %s1253_s11 = smov 16  }
  0x74   : > { %962 = dma.hbm_to_vmem [thread:$0]  (!%p1444_p10), %s1442_s5, 1024, %s1448_s7, %s1450_s9, %s1252_s6, %s1252_s6, %s1253_s11  }
  0x75   : > { %p1609_p9 = scmp.ne.s32.totalorder %s1603_s23, 0 }
  0x76   : > { %s1481_s28 = sand.u32 (!%p1609_p9), 1, %s1236_s16   ;;  %p1610_p13 = scmp.ne.s32.totalorder (!%p1609_p9), %s1601_s21, 0 }
  0x77   : > { %216 = sbr.rel (%p1609_p9) target bundleno = 842 (0x34a), region = 36  ;;  %s803_s25 = sshll.u32 (!%p1609_p9), %s1481_s28, 6 }
  0x78   : > { %s219_s26 = scalar_lea.sflag (!%p1609_p9), [#allocation3], %s1481_s28  ;;  %s1485_s12 = scalar_lea.vmem (!%p1609_p9), [#allocation2], %s803_s25 }
  0x7e   : > { %1215 = dma.done.wait (%p1610_p13), %s219_s26, 1024  }
  0x7f   : > { %1217 = vsyncadd (%p1610_p13), %s219_s26, 4294966272  ;;  %p1611_p10 = scmp.eq.s32.totalorder %s1303_s19, 0 }
  0x81   : > { %1219 = dma.done.wait (%p1611_p10), [#allocation6], 2064   ;;  %p1612_p8 = pmov %p1611_p10 }
  0x83   : > { %1221 = vsyncadd (%p1612_p8), [#allocation6], 4294965232  ;;  %p1613_p12 = pmov %p1612_p8 }
  0x84   : > { %p1614_p6 = pmov %p1612_p8 }
  0x85   : > { %1223 = dma.done.wait (%p1613_p12), [#allocation9], 1024  }
  0x86   : > { %1225 = vsyncadd (%p1614_p6), [#allocation9], 4294966272  ;;  %v1016_v0 = vld [vmem:[#allocation5 + $0x40] sm:$0xff]   ;;  %v1018_v2 = vld [vmem:[#allocation5 + $0x48] sm:$0xff]   ;;  %s807_s21 = sshll.u32 %s1481_s28, 5  ;;  %s840_s23 = sshll.u32 %s1303_s19, 9 }
  0x87   : > { %v1017_v1 = vld [vmem:[#allocation5] sm:$0xff]   ;;  %841 = vmatprep.subr.bf16.mxu0 %v1016_v0  ;;  %v1019_v3 = vld [vmem:[#allocation5 + $0x8] sm:$0xff]   ;;  %v1020_v4 = vld [vmem:[#allocation5 + $0x50] sm:$0xff]   ;;  %s258_s5 = scalar_lea.vmem [#allocation10], %s807_s21  ;;  %s1547_s29 = scalar_lea.hbm %s1597_s4, %s840_s23 }
  0x88   : > { %842 = vmatpush3.bf16.msra.mxu0 %v1017_v1  ;;  %v1021_v5 = vld [vmem:[#allocation5 + $0x10] sm:$0xff]   ;;  %v1022_v6 = vld [vmem:[#allocation5 + $0x58] sm:$0xff]   ;;  %v1024_v8 = vld [vmem:[#allocation5 + $0x60] sm:$0xff]   ;;  %s690_s7 = sshll.u32 %s258_s5, 4  ;;  %s677_s19 = scalar_lea.sflag [#allocation4], %s1481_s28  ;;  %s1549_s7 = int_to_ptr.vmem [resolvable:$true] %s690_s7 }
  0x89   : > { %843 = vmatprep.subr.bf16.mxu0 %v1018_v2  ;;  %v1023_v7 = vld [vmem:[#allocation5 + $0x18] sm:$0xff]   ;;  %v1025_v9 = vld [vmem:[#allocation5 + $0x20] sm:$0xff]   ;;  %v1026_v10 = vld [vmem:[#allocation5 + $0x68] sm:$0xff]   ;;  %s1170_s27 = scalar_lea.vmem %s1549_s7, 512  ;;  %s1254_s30 = smov [#allocation10]  }
  0x8a   : > { %v263_v11 = vld [vmem:[%s1485_s12 + $0x8] sm:$0xff]  ;;  %v265_v12 = vld [vmem:[%s1485_s12 + $0x18] sm:$0xff]  ;;  %v1028_v15 = vld [vmem:[#allocation5 + $0x70] sm:$0xff]   ;;  %p1171_p0 = scmp.ne.s32.totalorder %s1549_s7, %s1170_s27  ;;  %s1174_s14 = sshll.u32 %s1254_s30, 4  ;;  %s1175_s14 = int_to_ptr.vmem [resolvable:$false] %s1174_s14 }
  0x8b   : > { %v271_v13 = vpack.c.bf16 %v265_v12, %v263_v11  ;;  %v1027_v14 = vld [vmem:[#allocation5 + $0x28] sm:$0xff]   ;;  %v1029_v16 = vld [vmem:[#allocation5 + $0x30] sm:$0xff]   ;;  %v1030_v17 = vld [vmem:[#allocation5 + $0x78] sm:$0xff]   ;;  %s1176_s20 = scalar_lea.vmem %s1175_s14, 1024  ;;  %p1177_p11 = scmp.lt.s32.totalorder %s1549_s7, %s1175_s14 }
  0x8c   : > { %844 = vmatpush3.bf16.msra.mxu0 %v1019_v3  ;;  %v1031_v18 = vld [vmem:[#allocation5 + $0x38] sm:$0xff]   ;;  %v262_v19 = vld [vmem:[%s1485_s12] sm:$0xff]  ;;  %v264_v20 = vld [vmem:[%s1485_s12 + $0x10] sm:$0xff]  ;;  %p1172_p3 = pnand %p1171_p0, %p1433_p5  ;;  %p1178_p1 = scmp.lt.s32.totalorder %s1176_s20, %s1170_s27 }
  0x8d   : > { %845 = vmatprep.subr.bf16.mxu0 %v1020_v4  ;;  %441 = vmatprep.mubr.bf16.mxu0 %v271_v13  ;;  %v267_v21 = vld [vmem:[%s1485_s12 + $0x28] sm:$0xff]  ;;  %v269_v22 = vld [vmem:[%s1485_s12 + $0x38] sm:$0xff]  ;;  %v270_v23 = vpack.c.bf16 %v264_v20, %v262_v19  ;;  %v266_v25 = vld [vmem:[%s1485_s12 + $0x20] sm:$0xff] }
  0x8e   : > { %v273_v24 = vpack.c.bf16 %v269_v22, %v267_v21  ;;  %v268_v26 = vld [vmem:[%s1485_s12 + $0x30] sm:$0xff]  ;;  %v808_v29 = vld [vmem:[#allocation7] ss:$0 sm:$0xff]  ;;  %v1032_v45 = vld [vmem:[#allocation8] sm:$0xff]   ;;  %p1173_p7 = pneg %p1172_p3  ;;  %p1179_p2 = por %p1178_p1, %p1177_p11 }
  0x8f   : > { %v272_v27 = vpack.c.bf16 %v268_v26, %v266_v25  ;;  %889 = vmatprep.subr.bf16.mxu1 %v1032_v45  ;;  %v1033_v46 = vld [vmem:[#allocation8 + $0x8] sm:$0xff]   ;;  %v1034_v47 = vld [vmem:[#allocation8 + $0x10] sm:$0xff]   ;;  %v1035_v48 = vld [vmem:[#allocation8 + $0x18] sm:$0xff]  }
  0x90   : > { %846 = vmatpush3.bf16.msra.mxu0 %v1021_v5  ;;  %890 = vmatpush3.bf16.msra.mxu1 %v1032_v45  ;;  %v1036_v49 = vld [vmem:[#allocation8 + $0x20] sm:$0xff]   ;;  %v1037_v50 = vld [vmem:[#allocation8 + $0x28] sm:$0xff]   ;;  %v1038_v51 = vld [vmem:[#allocation8 + $0x30] sm:$0xff]   ;;  %p1180_p4 = pnand %p1179_p2, %p1173_p7 }
  0x91   : > { %847 = vmatprep.subr.bf16.mxu0 %v1022_v6  ;;  %891 = vmatprep.subr.bf16.mxu1 %v1033_v46  ;;  %v1039_v52 = vld [vmem:[#allocation8 + $0x38] sm:$0xff]  }
  0x94   : > { %848 = vmatpush3.bf16.msra.mxu0 %v1023_v7  ;;  %892 = vmatpush3.bf16.msra.mxu1 %v1033_v46 }
  0x95   : > { %849 = vmatprep.subr.bf16.mxu0 %v1024_v8  ;;  %893 = vmatprep.subr.bf16.mxu1 %v1034_v47 }
  0x98   : > { %850 = vmatpush3.bf16.msra.mxu0 %v1025_v9  ;;  %894 = vmatpush3.bf16.msra.mxu1 %v1034_v47 }
  0x99   : > { %851 = vmatprep.subr.bf16.mxu0 %v1026_v10  ;;  %895 = vmatprep.subr.bf16.mxu1 %v1035_v48 }
  0x9c   : > { %852 = vmatpush3.bf16.msra.mxu0 %v1027_v14  ;;  %896 = vmatpush3.bf16.msra.mxu1 %v1035_v48 }
  0x9d   : > { %853 = vmatprep.subr.bf16.mxu0 %v1028_v15  ;;  %897 = vmatprep.subr.bf16.mxu1 %v1036_v49 }
  0xa0   : > { %854 = vmatpush3.bf16.msra.mxu0 %v1029_v16  ;;  %898 = vmatpush3.bf16.msra.mxu1 %v1036_v49 }
  0xa1   : > { %855 = vmatprep.subr.bf16.mxu0 %v1030_v17  ;;  %899 = vmatprep.subr.bf16.mxu1 %v1037_v50 }
  0xa4   : > { %856 = vmatpush3.bf16.msra.mxu0 %v1031_v18  ;;  %900 = vmatpush3.bf16.msra.mxu1 %v1037_v50 }
  0xa5   : > { %901 = vmatprep.subr.bf16.mxu1 %v1038_v51 }
  0xa7   : > { %442 = vmatmul.mubr.bf16.vlgmr.msra.gmra.mrb[0].mxu0 %v270_v23 }
  0xa8   : > { %449 = vmatprep.mubr.bf16.mxu0 %v273_v24  ;;  %902 = vmatpush3.bf16.msra.mxu1 %v1038_v51 }
  0xa9   : > { %903 = vmatprep.subr.bf16.mxu1 %v1039_v52 }
  0xac   : > { %904 = vmatpush3.bf16.msra.mxu1 %v1039_v52 }
  0xad   : > { %909 = vmatprep.subr.bf16.mxu1 %v1032_v45 }
  0xaf   : > { %450 = vmatmul.mubr.bf16.gmra.mrb[4].mxu0 %v272_v27 }
 0x17a   : > { %v857_v28 = vpop.f32.mrb[0].mxu0 }
 0x17b   : > { %v858_v30 = vpop.f32.mrb[1].mxu0 }
 0x17c   : > { %v859_v31 = vadd.f32 %v858_v30, %v857_v28  ;;  %v860_v32 = vpop.f32.mrb[2].mxu0 }
 0x17d   : > { %v861_v33 = vpop.f32.mrb[3].mxu0 }
 0x17e   : > { %v1507_v34 = vadd.f32 %v859_v31, %v808_v29  ;;  %v862_v35 = vadd.f32 %v861_v33, %v860_v32 }
 0x180   : > { %458 = vmax.xlane.f32.xlu0 %v1507_v34  ;;  %v1510_v36 = vadd.f32 %v862_v35, %v808_v29 }
 0x182   : > { %v863_v37 = vpop.f32.mrb[4].mxu0 }
 0x183   : > { %v864_v38 = vpop.f32.mrb[5].mxu0 }
 0x184   : > { %v865_v39 = vadd.f32 %v864_v38, %v863_v37  ;;  %v866_v40 = vpop.f32.mrb[6].mxu0  ;;  %460 = vmax.xlane.f32.xlu0 %v1510_v36 }
 0x185   : > { %v867_v41 = vpop.f32.mrb[7].mxu0 }
 0x186   : > { %v1513_v42 = vadd.f32 %v865_v39, %v808_v29  ;;  %v868_v43 = vadd.f32 %v867_v41, %v866_v40 }
 0x188   : > { %462 = vmax.xlane.f32.xlu1 %v1513_v42  ;;  %v1516_v44 = vadd.f32 %v868_v43, %v808_v29 }
 0x18c   : > { %464 = vmax.xlane.f32.xlu1 %v1516_v44 }
 0x20d   : > { %v1519_v53 = vpop.xlane.xlu0 %458 }
 0x20e   : > { %v466_v54 = vsub.f32 %v1507_v34, %v1519_v53 }
 0x210   : > { %v470_v55 = vmul.f32 1.442695, %v466_v54 }
 0x211   : > { %v1523_v56 = vpop.xlane.xlu0 %460 }
 0x212   : > { %v467_v57 = vsub.f32 %v1510_v36, %v1523_v56  ;;  %1040 = vpow2.f32 %v470_v55 }
 0x214   : > { %v472_v58 = vmul.f32 1.442695, %v467_v57 }
 0x215   : > { %v1527_v59 = vpop.xlane.xlu1 %462 }
 0x216   : > { %1042 = vpow2.f32 %v472_v58  ;;  %v468_v60 = vsub.f32 %v1513_v42, %v1527_v59 }
 0x218   : > { %v474_v61 = vmul.f32 1.442695, %v468_v60 }
 0x219   : > { %v1531_v62 = vpop.xlane.xlu1 %464 }
 0x21a   : > { %v469_v63 = vsub.f32 %v1516_v44, %v1531_v62  ;;  %1044 = vpow2.f32 %v474_v61 }
 0x21c   : > { %v476_v0 = vmul.f32 1.442695, %v469_v63  ;;  %v1041_v1 = vpop.eup %1040 }
 0x21e   : > { %1046 = vpow2.f32 %v476_v0 }
 0x220   : > { %v1043_v2 = vpop.eup %1042 }
 0x221   : > { %v478_v3 = vpack.c.bf16 %v1043_v2, %v1041_v1 }
 0x223   : > { %v480_v4 = vunpack.c.l.bf16 %v478_v3  ;;  %v481_v5 = vunpack.c.h.bf16 %v478_v3 }
 0x224   : > { %v1045_v8 = vpop.eup %1044 }
 0x225   : > { %v484_v6 = vsub.f32 %v1041_v1, %v480_v4  ;;  %v485_v7 = vsub.f32 %v1043_v2, %v481_v5 }
 0x227   : > { %v488_v9 = vpack.c.bf16 %v485_v7, %v484_v6 }
 0x228   : > { %v1047_v10 = vpop.eup %1046 }
 0x229   : > { %905 = vmatprep.mubr.bf16.mxu1 %v488_v9  ;;  %v479_v11 = vpack.c.bf16 %v1047_v10, %v1045_v8 }
 0x22b   : > { %v482_v12 = vunpack.c.l.bf16 %v479_v11  ;;  %v483_v13 = vunpack.c.h.bf16 %v479_v11 }
 0x22d   : > { %v486_v14 = vsub.f32 %v1045_v8, %v482_v12  ;;  %v487_v15 = vsub.f32 %v1047_v10, %v483_v13 }
 0x22f   : > { %v489_v16 = vpack.c.bf16 %v487_v15, %v486_v14 }
 0x231   : > { %906 = vmatmul.mubr.bf16.vlgmr.msra.gmra.mrb[0].mxu1 %v489_v16 }
 0x232   : > { %910 = vmatpush3.bf16.msra.mxu1 %v1032_v45  ;;  %925 = vmatprep.mubr.bf16.mxu1 %v478_v3 }
 0x233   : > { %911 = vmatprep.subr.bf16.mxu1 %v1033_v46 }
 0x236   : > { %912 = vmatpush3.bf16.msra.mxu1 %v1033_v46 }
 0x237   : > { %913 = vmatprep.subr.bf16.mxu1 %v1034_v47 }
 0x23a   : > { %914 = vmatpush3.bf16.msra.mxu1 %v1034_v47 }
 0x23b   : > { %915 = vmatprep.subr.bf16.mxu1 %v1035_v48 }
 0x23e   : > { %916 = vmatpush3.bf16.msra.mxu1 %v1035_v48 }
 0x23f   : > { %917 = vmatprep.subr.bf16.mxu1 %v1036_v49 }
 0x242   : > { %918 = vmatpush3.bf16.msra.mxu1 %v1036_v49 }
 0x243   : > { %919 = vmatprep.subr.bf16.mxu1 %v1037_v50 }
 0x246   : > { %920 = vmatpush3.bf16.msra.mxu1 %v1037_v50 }
 0x247   : > { %921 = vmatprep.subr.bf16.mxu1 %v1038_v51 }
 0x24a   : > { %922 = vmatpush3.bf16.msra.mxu1 %v1038_v51 }
 0x24b   : > { %923 = vmatprep.subr.bf16.mxu1 %v1039_v52 }
 0x24e   : > { %924 = vmatpush3.bf16.msra.mxu1 %v1039_v52 }
 0x251   : > { %926 = vmatmul.mubr.bf16.vlgmr.msra.gmra.mrb[0].mxu1 %v479_v11 }
 0x324   : > { %v927_v17 = vpop.f32.mrb[0].mxu1 }
 0x325   : > { %v654_v18 = vmax.f32 %v927_v17, 1.1754944e-38  ;;  %v637_v19 = vpop.f32.mrb[1].mxu1 }
 0x326   : > { %v652_v20 = vmax.f32 %v637_v19, 1.1754944e-38  ;;  %v928_v21 = vpop.f32.mrb[2].mxu1 }
 0x327   : > { %1048 = vlog2.f32 %v654_v18  ;;  %v655_v22 = vmax.f32 %v928_v21, 1.1754944e-38  ;;  %v640_v23 = vpop.f32.mrb[3].mxu1 }
 0x328   : > { %1050 = vlog2.f32 %v652_v20  ;;  %v653_v24 = vmax.f32 %v640_v23, 1.1754944e-38 }
 0x329   : > { %1052 = vlog2.f32 %v655_v22 }
 0x32a   : > { %1054 = vlog2.f32 %v653_v24 }
 0x331   : > { %v1049_v25 = vpop.eup %1048 }
 0x332   : > { %v1051_v26 = vpop.eup %1050  ;;  %v661_v27 = vmul.f32 0.6931472, %v1049_v25 }
 0x333   : > { %v1053_v28 = vpop.eup %1052  ;;  %v657_v29 = vmul.f32 0.6931472, %v1051_v26 }
 0x334   : > { %v1055_v30 = vpop.eup %1054  ;;  %v666_v31 = vadd.f32 %v661_v27, %v1527_v59  ;;  %v663_v32 = vmul.f32 0.6931472, %v1053_v28 }
 0x335   : > { %v664_v33 = vadd.f32 %v657_v29, %v1519_v53  ;;  %v659_v35 = vmul.f32 0.6931472, %v1055_v30 }
 0x336   : > { %v670_v37 = vsub.f32 %v1513_v42, %v666_v31  ;;  %v667_v38 = vadd.f32 %v663_v32, %v1531_v62 }
 0x337   : > { %v668_v39 = vsub.f32 %v1507_v34, %v664_v33  ;;  %v665_v40 = vadd.f32 %v659_v35, %v1523_v56 }
 0x338   : > { %674 = vst [vmem:[%s258_s5 + $0x10] sm:$0xff] %v670_v37  ;;  %v671_v41 = vsub.f32 %v1516_v44, %v667_v38 }
 0x339   : > { %672 = vst [vmem:[%s258_s5] sm:$0xff] %v668_v39  ;;  %v669_v42 = vsub.f32 %v1510_v36, %v665_v40 }
 0x33a   : > { %675 = vst [vmem:[%s258_s5 + $0x18] sm:$0xff] %v671_v41 }
 0x33b   : > { %673 = vst [vmem:[%s258_s5 + $0x8] sm:$0xff] %v669_v42 }
 0x33c   : > { %1183 = shalt.err (!%p1180_p4)
}
 0x33d   : > { %s1184_s6 = scalar_lea.hbm %s1547_s29, 512  ;;  %s1188_s26 = scalar_lea.hbm %s1597_s4, 2048 }
 0x33e   : > { %p1185_p9 = scmp.ne.s32.totalorder %s1547_s29, %s1184_s6  ;;  %p1189_p8 = scmp.lt.u32.totalorder %s1547_s29, %s1597_s4 }
 0x33f   : > { %p1190_p12 = scmp.lt.u32.totalorder %s1188_s26, %s1184_s6  ;;  %p1192_p0 = scmp.lt.u32.totalorder %s1184_s6, %s1547_s29 }
 0x340   : > { %p1186_p13 = pnand %p1185_p9, %p1433_p5 }
 0x341   : > { %p1191_p6 = por %p1190_p12, %p1189_p8 }
 0x342   : > { %p1187_p10 = pneg %p1186_p13 }
 0x343   : > { %p1193_p3 = por %p1192_p0, %p1191_p6 }
 0x345   : > { %p1194_p7 = pnand %p1193_p3, %p1187_p10 }
 0x347   : > { %1197 = shalt.err (!%p1194_p7)
}
 0x348   : > { %s1255_s23 = smov 128   ;;  %s1256_s5 = smov 8  }
 0x349   : > { %947 = dma.vmem_to_hbm [thread:$0]  (%p1433_p5), %s1549_s7, 512, %s1547_s29, %s677_s19, %s1255_s23, %s1255_s23, %s1256_s5  }
 0x34a PF: > { %p974_p11 = scmp.ge.s32.totalorder %s1244_s18, 2  ;;  %s705_s8 = sand.u32 1, %s1232_s15  }
 0x34b   : > { %p1615_p1 = scmp.ne.s32.totalorder %s1602_s22, 0  ;;  %s706_s9 = scalar_lea.sflag [#allocation4], %s705_s8 }
 0x34d   : > { %p964_p2 = pnand %p974_p11, %p1615_p1 }
 0x34f   : > { %1227 = dma.done.wait (!%p964_p2), %s706_s9, 512  }
 0x350   : > { %1229 = vsyncadd (!%p964_p2), %s706_s9, 4294966784  ;;  %p19_p4 = scmp.ge.s32.totalorder %s1419_s10, 6   ;;  %s1616_s15 = smov %s1236_s16 }
 0x351   : > { %s1617_s16 = smov %s1240_s17  ;;  %s1618_s17 = smov %s1429_s13 }
 0x352   : > { %s1619_s18 = smov %s1419_s10  ;;  %21 = sbr.rel (!%p19_p4) target bundleno = 7 (0x7), region = 93 }
 0x359   :  { %711 = vsyncpa [#allocation3], 1 }
 0x35a   :  { %713 = vsyncpa [#allocation3 + $0x1], 1 }
 0x35b   :  { %714 = vsyncpa [#allocation6], 1 }
 0x35c   :  { %715 = vsyncpa [#allocation9], 1 }
 0x35d   :  { %716 = vsyncpa [#allocation4], 1 }
 0x35e   :  { %718 = vsyncpa [#allocation4 + $0x1], 1 }

</bundles_post_ra>
